<compile_context>
chip_gen: v7x
topology: tpu7x:2x2x1
jax: 0.10.0
libtpu: 0.0.40
codegen_flags: <defaults>
</compile_context>

<pallas_src>
import functools

import jax
import jax.numpy as jnp
from jax import lax
from jax.experimental import pallas as pl
from jax.experimental.pallas import tpu as pltpu


def rnn_linear_kernel(x_ref, wih_ref, whh_ref, b_ref, wlin_ref, blin_ref,
                      out_ref, xp_ref, *, seq_len, bb):
    """One batch-block of the RNN + Linear forward.

    x_ref   : (T, bb, Hp)   time-major input slab (lane-dense Hp)
    wih_ref : (Hp, Hp)      W_ih^T (zero padded)
    whh_ref : (Hp, Hp)      W_hh^T (zero padded)
    b_ref   : (1, Hp)       b_ih + b_hh (zero padded)
    wlin_ref: (Hp, Np)      W_lin^T (zero padded)
    blin_ref: (1, Np)       b_lin (zero padded)
    out_ref : (T, bb, Np)   emissions
    xp_ref  : (T*bb, Hp)    VMEM scratch: precomputed input projections
    """
    hp = whh_ref.shape[0]
    np_ = wlin_ref.shape[1]

    # Phase 1: x @ W_ih^T + (b_ih + b_hh) for all timesteps in one MXU matmul.
    x2d = x_ref[...].reshape(seq_len * bb, hp)
    xp_ref[...] = (
        jnp.dot(x2d, wih_ref[...], preferred_element_type=jnp.float32)
        + b_ref[...])

    # Hoist loop-invariant operands (loaded / broadcast exactly once).
    whh = whh_ref[...]
    wlin = wlin_ref[...]
    blin = jnp.broadcast_to(blin_ref[...], (bb, np_))

    # Phase 2 + fused Phase 3: serial recurrence, h carried in vregs.
    def step(t, h):
        row = pl.multiple_of(t * bb, bb)
        pre = xp_ref[pl.ds(row, bb), :] + jnp.dot(
            h, whh, preferred_element_type=jnp.float32)
        h_new = jnp.tanh(pre)
        # Output projection is independent of the next recurrence step: it
        # hides under the serial h@W_hh chain and removes the hs scratch slab.
        out_ref[t] = (jnp.dot(h_new, wlin, preferred_element_type=jnp.float32)
                      + blin).astype(out_ref.dtype)
        return h_new

    h0 = jnp.zeros((bb, hp), jnp.float32)
    lax.fori_loop(0, seq_len, step, h0,
                  unroll=True if seq_len <= 16 else 8)


def _round_up(x, m):
    return ((x + m - 1) // m) * m


def crf_model_forward(x, w_ih, w_hh, b_ih, b_hh, w_lin, b_lin):
    """x: (B, T, H) batch-first, like the PyTorch module. Returns (B, T, num_tags)."""
    B, T, H = x.shape
    num_tags = w_lin.shape[0]

    bb = 8                                         # sublane-full batch block
    b_pad = _round_up(max(B, bb), bb)
    h_pad = _round_up(max(H, 128), 128)            # lane-dense hidden dim
    n_pad = _round_up(max(num_tags, 128), 128)     # lane-dense output width
    n_blocks = b_pad // bb

    f32 = jnp.float32
    # Time-major, batch + feature zero-padded: (T, B_pad, H_pad).
    # TODO(synk): at large T*B this transpose/pad is an extra HBM pass; fold it
    # into the kernel's in_spec index_map (strided DMA) when scaling up.
    x_tm = jnp.transpose(x.astype(f32), (1, 0, 2))
    x_tm = jnp.pad(x_tm, ((0, 0), (0, b_pad - B), (0, h_pad - H)))

    # Zero-padded weights/bias keep the padded hidden columns exactly 0 through
    # tanh (zero weights + zero bias + tanh(0) = 0), so numerics are unchanged.
    wih_t = jnp.pad(jnp.transpose(w_ih).astype(f32),
                    ((0, h_pad - H), (0, h_pad - H)))
    whh_t = jnp.pad(jnp.transpose(w_hh).astype(f32),
                    ((0, h_pad - H), (0, h_pad - H)))
    b_comb = jnp.pad((b_ih + b_hh).astype(f32), (0, h_pad - H)).reshape(1, h_pad)
    wlin_p = jnp.pad(jnp.transpose(w_lin).astype(f32),
                     ((0, h_pad - H), (0, n_pad - num_tags)))
    blin_p = jnp.pad(b_lin.astype(f32), (0, n_pad - num_tags)).reshape(1, n_pad)

    kernel = functools.partial(rnn_linear_kernel, seq_len=T, bb=bb)

    out = pl.pallas_call(
        kernel,
        out_shape=jax.ShapeDtypeStruct((T, b_pad, n_pad), f32),
        grid_spec=pltpu.PrefetchScalarGridSpec(
            num_scalar_prefetch=0,
            grid=(n_blocks,),                      # independent batch blocks
            in_specs=[
                pl.BlockSpec((T, bb, h_pad), lambda i: (0, i, 0)),   # x
                pl.BlockSpec((h_pad, h_pad), lambda i: (0, 0)),      # W_ih^T
                pl.BlockSpec((h_pad, h_pad), lambda i: (0, 0)),      # W_hh^T
                pl.BlockSpec((1, h_pad), lambda i: (0, 0)),          # b_ih+b_hh
                pl.BlockSpec((h_pad, n_pad), lambda i: (0, 0)),      # W_lin^T
                pl.BlockSpec((1, n_pad), lambda i: (0, 0)),          # b_lin
            ],
            out_specs=pl.BlockSpec((T, bb, n_pad), lambda i: (0, i, 0)),
            scratch_shapes=[
                pltpu.VMEM((T * bb, h_pad), f32),  # single scratch slab (xp)
            ],
        ),
        compiler_params=pltpu.CompilerParams(
            # Batch blocks are row-independent -> "parallel" lets v7x's two
            # TensorCores split the batch; no effect on single-TC v5e/v6e.
            dimension_semantics=("parallel",),
            vmem_limit_bytes=32 * 1024 * 1024,
        ),
    )(x_tm, wih_t, whh_t, b_comb, wlin_p, blin_p)

    out = out[:, :B, :num_tags]                    # drop batch / tag padding
    return jnp.transpose(out, (1, 0, 2))           # (B, T, num_tags)


def reference_forward(x, w_ih, w_hh, b_ih, b_hh, w_lin, b_lin):
    """Pure-JAX reference matching torch.nn.RNN(batch_first=True) + Linear."""
    B, T, H = x.shape

    def step(h, x_t):
        h_new = jnp.tanh(x_t @ w_ih.T + b_ih + h @ w_hh.T + b_hh)
        return h_new, h_new

    x_tm = jnp.transpose(x, (1, 0, 2))
    _, hs = lax.scan(step, jnp.zeros((B, H), jnp.float32), x_tm)
    rnn_out = jnp.transpose(hs, (1, 0, 2))         # (B, T, H)
    return rnn_out @ w_lin.T + b_lin


if __name__ == "__main__":
    # Module spec: nn.RNN(68, 68, batch_first=True) -> nn.Linear(68, num_tags).
    # tag_to_idx is empty in the source (num_tags would be 0); pick 8 tags for
    # a non-degenerate demo.
    # TODO(synk): CRF layer is built in __init__ but unused in forward(); not implemented.
    B, T, H, NUM_TAGS = 2, 8, 68, 8

    key = jax.random.PRNGKey(0)
    kx, k1, k2, k3, k4, k5, k6 = jax.random.split(key, 7)
    bound = float(1.0 / (H ** 0.5))

    x = jax.random.normal(kx, (B, T, H), dtype=jnp.float32)
    w_ih = jax.random.uniform(k1, (H, H), jnp.float32, -bound, bound)
    w_hh = jax.random.uniform(k2, (H, H), jnp.float32, -bound, bound)
    b_ih = jax.random.uniform(k3, (H,), jnp.float32, -bound, bound)
    b_hh = jax.random.uniform(k4, (H,), jnp.float32, -bound, bound)
    w_lin = jax.random.uniform(k5, (NUM_TAGS, H), jnp.float32, -bound, bound)
    b_lin = jax.random.uniform(k6, (NUM_TAGS,), jnp.float32, -bound, bound)

    out = crf_model_forward(x, w_ih, w_hh, b_ih, b_hh, w_lin, b_lin)
    out = jax.block_until_ready(out)

    ref = reference_forward(x, w_ih, w_hh, b_ih, b_hh, w_lin, b_lin)
    assert out.shape == (B, T, NUM_TAGS)
    assert jnp.allclose(out, ref, atol=1e-5, rtol=1e-5), float(jnp.abs(out - ref).max())

    print("KERNEL_OK")
</pallas_src>

<mosaic_0001>
module attributes {stable_mosaic.version = 11 : i64} {
  func.func @rnn_linear_kernel(%arg0: i32, %arg1: memref<8x8x128xf32, #tpu.memory_space<vmem>>, %arg2: memref<128x128xf32, #tpu.memory_space<vmem>>, %arg3: memref<128x128xf32, #tpu.memory_space<vmem>>, %arg4: memref<1x128xf32, #tpu.memory_space<vmem>>, %arg5: memref<128x128xf32, #tpu.memory_space<vmem>>, %arg6: memref<1x128xf32, #tpu.memory_space<vmem>>, %arg7: memref<8x8x128xf32, #tpu.memory_space<vmem>>, %arg8: memref<64x128xf32, #tpu.memory_space<vmem>>) attributes {dimension_semantics = [#tpu.dimension_semantics<parallel>], iteration_bounds = array<i64: 1>, scalar_prefetch = 0 : i64, scratch_operands = 1 : i64, tpu.core_type = #tpu.core_type<tc>, window_params = [{transform_indices = @transform_0, window_bounds = array<i64: 8, 8, 128>}, {pipeline_mode = #tpu.pipeline_mode<synchronous>, transform_indices = @transform_1, window_bounds = array<i64: 128, 128>}, {pipeline_mode = #tpu.pipeline_mode<synchronous>, transform_indices = @transform_2, window_bounds = array<i64: 128, 128>}, {pipeline_mode = #tpu.pipeline_mode<synchronous>, transform_indices = @transform_3, window_bounds = array<i64: 1, 128>}, {pipeline_mode = #tpu.pipeline_mode<synchronous>, transform_indices = @transform_4, window_bounds = array<i64: 128, 128>}, {pipeline_mode = #tpu.pipeline_mode<synchronous>, transform_indices = @transform_5, window_bounds = array<i64: 1, 128>}, {transform_indices = @transform_6, window_bounds = array<i64: 8, 8, 128>}]} {
    %c0 = arith.constant 0 : index
    %c0_0 = arith.constant 0 : index
    %c0_1 = arith.constant 0 : index
    %0 = vector.load %arg1[%c0, %c0_0, %c0_1] : memref<8x8x128xf32, #tpu.memory_space<vmem>>, vector<8x8x128xf32>
    %1 = vector.shape_cast %0 : vector<8x8x128xf32> to vector<64x128xf32>
    %c0_2 = arith.constant 0 : index
    %c0_3 = arith.constant 0 : index
    %2 = vector.load %arg2[%c0_2, %c0_3] : memref<128x128xf32, #tpu.memory_space<vmem>>, vector<128x128xf32>
    %cst = arith.constant dense<0.000000e+00> : vector<64x128xf32>
    %3 = tpu.matmul %1, %2, %cst {dimension_numbers = #tpu.dot_dimension_numbers<[1], [0], [0], [1], [0, 0, 1, 1], [], []>} : vector<64x128xf32>, vector<128x128xf32>, vector<64x128xf32> -> vector<64x128xf32>
    %c0_4 = arith.constant 0 : index
    %c0_5 = arith.constant 0 : index
    %4 = vector.load %arg4[%c0_4, %c0_5] : memref<1x128xf32, #tpu.memory_space<vmem>>, vector<1x128xf32>
    %5 = vector.broadcast %4 : vector<1x128xf32> to vector<64x128xf32>
    %6 = arith.addf %3, %5 : vector<64x128xf32>
    %c0_6 = arith.constant 0 : index
    %c0_7 = arith.constant 0 : index
    %7 = vector.load %arg8[%c0_6, %c0_7] : memref<64x128xf32, #tpu.memory_space<vmem>>, vector<64x128xf32>
    tpu.vector_store %arg8[%c0_6, %c0_7], %6 {strides = array<i32>} : memref<64x128xf32, #tpu.memory_space<vmem>>, vector<64x128xf32>,
    %c0_8 = arith.constant 0 : index
    %c0_9 = arith.constant 0 : index
    %8 = vector.load %arg3[%c0_8, %c0_9] : memref<128x128xf32, #tpu.memory_space<vmem>>, vector<128x128xf32>
    %c0_10 = arith.constant 0 : index
    %c0_11 = arith.constant 0 : index
    %9 = vector.load %arg5[%c0_10, %c0_11] : memref<128x128xf32, #tpu.memory_space<vmem>>, vector<128x128xf32>
    %c0_12 = arith.constant 0 : index
    %c0_13 = arith.constant 0 : index
    %10 = vector.load %arg6[%c0_12, %c0_13] : memref<1x128xf32, #tpu.memory_space<vmem>>, vector<1x128xf32>
    %11 = vector.shape_cast %10 : vector<1x128xf32> to vector<1x128xf32>
    %12 = vector.broadcast %11 : vector<1x128xf32> to vector<8x128xf32>
    %cst_14 = arith.constant 0.000000e+00 : f32
    %13 = vector.broadcast %cst_14 : f32 to vector<8x128xf32>
    %c0_i32 = arith.constant 0 : i32
    %c8_i32 = arith.constant 8 : i32
    %14 = arith.muli %c0_i32, %c8_i32 : i32
    %15 = tpu.assume_multiple %14, 8 : i32
    %16 = arith.index_cast %15 : i32 to index
    %c0_15 = arith.constant 0 : index
    %17 = vector.load %arg8[%16, %c0_15] : memref<64x128xf32, #tpu.memory_space<vmem>>, vector<8x128xf32>
    %cst_16 = arith.constant dense<0.000000e+00> : vector<8x128xf32>
    %18 = tpu.matmul %13, %8, %cst_16 {dimension_numbers = #tpu.dot_dimension_numbers<[1], [0], [0], [1], [0, 0, 1, 1], [], []>} : vector<8x128xf32>, vector<128x128xf32>, vector<8x128xf32> -> vector<8x128xf32>
    %19 = arith.addf %17, %18 : vector<8x128xf32>
    %20 = math.tanh %19 : vector<8x128xf32>
    %cst_17 = arith.constant dense<0.000000e+00> : vector<8x128xf32>
    %21 = tpu.matmul %20, %9, %cst_17 {dimension_numbers = #tpu.dot_dimension_numbers<[1], [0], [0], [1], [0, 0, 1, 1], [], []>} : vector<8x128xf32>, vector<128x128xf32>, vector<8x128xf32> -> vector<8x128xf32>
    %22 = arith.addf %21, %12 : vector<8x128xf32>
    %23 = arith.index_cast %c0_i32 : i32 to index
    %c0_18 = arith.constant 0 : index
    %c0_19 = arith.constant 0 : index
    %24 = vector.load %arg7[%23, %c0_18, %c0_19] : memref<8x8x128xf32, #tpu.memory_space<vmem>>, vector<1x8x128xf32>
    %25 = vector.shape_cast %24 : vector<1x8x128xf32> to vector<8x128xf32>
    %26 = vector.shape_cast %22 : vector<8x128xf32> to vector<1x8x128xf32>
    tpu.vector_store %arg7[%23, %c0_18, %c0_19], %26 {strides = array<i32>} : memref<8x8x128xf32, #tpu.memory_space<vmem>>, vector<1x8x128xf32>,
    %c1_i32 = arith.constant 1 : i32
    %c8_i32_20 = arith.constant 8 : i32
    %27 = arith.muli %c1_i32, %c8_i32_20 : i32
    %28 = tpu.assume_multiple %27, 8 : i32
    %29 = arith.index_cast %28 : i32 to index
    %c0_21 = arith.constant 0 : index
    %30 = vector.load %arg8[%29, %c0_21] : memref<64x128xf32, #tpu.memory_space<vmem>>, vector<8x128xf32>
    %cst_22 = arith.constant dense<0.000000e+00> : vector<8x128xf32>
    %31 = tpu.matmul %20, %8, %cst_22 {dimension_numbers = #tpu.dot_dimension_numbers<[1], [0], [0], [1], [0, 0, 1, 1], [], []>} : vector<8x128xf32>, vector<128x128xf32>, vector<8x128xf32> -> vector<8x128xf32>
    %32 = arith.addf %30, %31 : vector<8x128xf32>
    %33 = math.tanh %32 : vector<8x128xf32>
    %cst_23 = arith.constant dense<0.000000e+00> : vector<8x128xf32>
    %34 = tpu.matmul %33, %9, %cst_23 {dimension_numbers = #tpu.dot_dimension_numbers<[1], [0], [0], [1], [0, 0, 1, 1], [], []>} : vector<8x128xf32>, vector<128x128xf32>, vector<8x128xf32> -> vector<8x128xf32>
    %35 = arith.addf %34, %12 : vector<8x128xf32>
    %36 = arith.index_cast %c1_i32 : i32 to index
    %c0_24 = arith.constant 0 : index
    %c0_25 = arith.constant 0 : index
    %37 = vector.load %arg7[%36, %c0_24, %c0_25] : memref<8x8x128xf32, #tpu.memory_space<vmem>>, vector<1x8x128xf32>
    %38 = vector.shape_cast %37 : vector<1x8x128xf32> to vector<8x128xf32>
    %39 = vector.shape_cast %35 : vector<8x128xf32> to vector<1x8x128xf32>
    tpu.vector_store %arg7[%36, %c0_24, %c0_25], %39 {strides = array<i32>} : memref<8x8x128xf32, #tpu.memory_space<vmem>>, vector<1x8x128xf32>,
    %c2_i32 = arith.constant 2 : i32
    %c8_i32_26 = arith.constant 8 : i32
    %40 = arith.muli %c2_i32, %c8_i32_26 : i32
    %41 = tpu.assume_multiple %40, 8 : i32
    %42 = arith.index_cast %41 : i32 to index
    %c0_27 = arith.constant 0 : index
    %43 = vector.load %arg8[%42, %c0_27] : memref<64x128xf32, #tpu.memory_space<vmem>>, vector<8x128xf32>
    %cst_28 = arith.constant dense<0.000000e+00> : vector<8x128xf32>
    %44 = tpu.matmul %33, %8, %cst_28 {dimension_numbers = #tpu.dot_dimension_numbers<[1], [0], [0], [1], [0, 0, 1, 1], [], []>} : vector<8x128xf32>, vector<128x128xf32>, vector<8x128xf32> -> vector<8x128xf32>
    %45 = arith.addf %43, %44 : vector<8x128xf32>
    %46 = math.tanh %45 : vector<8x128xf32>
    %cst_29 = arith.constant dense<0.000000e+00> : vector<8x128xf32>
    %47 = tpu.matmul %46, %9, %cst_29 {dimension_numbers = #tpu.dot_dimension_numbers<[1], [0], [0], [1], [0, 0, 1, 1], [], []>} : vector<8x128xf32>, vector<128x128xf32>, vector<8x128xf32> -> vector<8x128xf32>
    %48 = arith.addf %47, %12 : vector<8x128xf32>
    %49 = arith.index_cast %c2_i32 : i32 to index
    %c0_30 = arith.constant 0 : index
    %c0_31 = arith.constant 0 : index
    %50 = vector.load %arg7[%49, %c0_30, %c0_31] : memref<8x8x128xf32, #tpu.memory_space<vmem>>, vector<1x8x128xf32>
    %51 = vector.shape_cast %50 : vector<1x8x128xf32> to vector<8x128xf32>
    %52 = vector.shape_cast %48 : vector<8x128xf32> to vector<1x8x128xf32>
    tpu.vector_store %arg7[%49, %c0_30, %c0_31], %52 {strides = array<i32>} : memref<8x8x128xf32, #tpu.memory_space<vmem>>, vector<1x8x128xf32>,
    %c3_i32 = arith.constant 3 : i32
    %c8_i32_32 = arith.constant 8 : i32
    %53 = arith.muli %c3_i32, %c8_i32_32 : i32
    %54 = tpu.assume_multiple %53, 8 : i32
    %55 = arith.index_cast %54 : i32 to index
    %c0_33 = arith.constant 0 : index
    %56 = vector.load %arg8[%55, %c0_33] : memref<64x128xf32, #tpu.memory_space<vmem>>, vector<8x128xf32>
    %cst_34 = arith.constant dense<0.000000e+00> : vector<8x128xf32>
    %57 = tpu.matmul %46, %8, %cst_34 {dimension_numbers = #tpu.dot_dimension_numbers<[1], [0], [0], [1], [0, 0, 1, 1], [], []>} : vector<8x128xf32>, vector<128x128xf32>, vector<8x128xf32> -> vector<8x128xf32>
    %58 = arith.addf %56, %57 : vector<8x128xf32>
    %59 = math.tanh %58 : vector<8x128xf32>
    %cst_35 = arith.constant dense<0.000000e+00> : vector<8x128xf32>
    %60 = tpu.matmul %59, %9, %cst_35 {dimension_numbers = #tpu.dot_dimension_numbers<[1], [0], [0], [1], [0, 0, 1, 1], [], []>} : vector<8x128xf32>, vector<128x128xf32>, vector<8x128xf32> -> vector<8x128xf32>
    %61 = arith.addf %60, %12 : vector<8x128xf32>
    %62 = arith.index_cast %c3_i32 : i32 to index
    %c0_36 = arith.constant 0 : index
    %c0_37 = arith.constant 0 : index
    %63 = vector.load %arg7[%62, %c0_36, %c0_37] : memref<8x8x128xf32, #tpu.memory_space<vmem>>, vector<1x8x128xf32>
    %64 = vector.shape_cast %63 : vector<1x8x128xf32> to vector<8x128xf32>
    %65 = vector.shape_cast %61 : vector<8x128xf32> to vector<1x8x128xf32>
    tpu.vector_store %arg7[%62, %c0_36, %c0_37], %65 {strides = array<i32>} : memref<8x8x128xf32, #tpu.memory_space<vmem>>, vector<1x8x128xf32>,
    %c4_i32 = arith.constant 4 : i32
    %c8_i32_38 = arith.constant 8 : i32
    %66 = arith.muli %c4_i32, %c8_i32_38 : i32
    %67 = tpu.assume_multiple %66, 8 : i32
    %68 = arith.index_cast %67 : i32 to index
    %c0_39 = arith.constant 0 : index
    %69 = vector.load %arg8[%68, %c0_39] : memref<64x128xf32, #tpu.memory_space<vmem>>, vector<8x128xf32>
    %cst_40 = arith.constant dense<0.000000e+00> : vector<8x128xf32>
    %70 = tpu.matmul %59, %8, %cst_40 {dimension_numbers = #tpu.dot_dimension_numbers<[1], [0], [0], [1], [0, 0, 1, 1], [], []>} : vector<8x128xf32>, vector<128x128xf32>, vector<8x128xf32> -> vector<8x128xf32>
    %71 = arith.addf %69, %70 : vector<8x128xf32>
    %72 = math.tanh %71 : vector<8x128xf32>
    %cst_41 = arith.constant dense<0.000000e+00> : vector<8x128xf32>
    %73 = tpu.matmul %72, %9, %cst_41 {dimension_numbers = #tpu.dot_dimension_numbers<[1], [0], [0], [1], [0, 0, 1, 1], [], []>} : vector<8x128xf32>, vector<128x128xf32>, vector<8x128xf32> -> vector<8x128xf32>
    %74 = arith.addf %73, %12 : vector<8x128xf32>
    %75 = arith.index_cast %c4_i32 : i32 to index
    %c0_42 = arith.constant 0 : index
    %c0_43 = arith.constant 0 : index
    %76 = vector.load %arg7[%75, %c0_42, %c0_43] : memref<8x8x128xf32, #tpu.memory_space<vmem>>, vector<1x8x128xf32>
    %77 = vector.shape_cast %76 : vector<1x8x128xf32> to vector<8x128xf32>
    %78 = vector.shape_cast %74 : vector<8x128xf32> to vector<1x8x128xf32>
    tpu.vector_store %arg7[%75, %c0_42, %c0_43], %78 {strides = array<i32>} : memref<8x8x128xf32, #tpu.memory_space<vmem>>, vector<1x8x128xf32>,
    %c5_i32 = arith.constant 5 : i32
    %c8_i32_44 = arith.constant 8 : i32
    %79 = arith.muli %c5_i32, %c8_i32_44 : i32
    %80 = tpu.assume_multiple %79, 8 : i32
    %81 = arith.index_cast %80 : i32 to index
    %c0_45 = arith.constant 0 : index
    %82 = vector.load %arg8[%81, %c0_45] : memref<64x128xf32, #tpu.memory_space<vmem>>, vector<8x128xf32>
    %cst_46 = arith.constant dense<0.000000e+00> : vector<8x128xf32>
    %83 = tpu.matmul %72, %8, %cst_46 {dimension_numbers = #tpu.dot_dimension_numbers<[1], [0], [0], [1], [0, 0, 1, 1], [], []>} : vector<8x128xf32>, vector<128x128xf32>, vector<8x128xf32> -> vector<8x128xf32>
    %84 = arith.addf %82, %83 : vector<8x128xf32>
    %85 = math.tanh %84 : vector<8x128xf32>
    %cst_47 = arith.constant dense<0.000000e+00> : vector<8x128xf32>
    %86 = tpu.matmul %85, %9, %cst_47 {dimension_numbers = #tpu.dot_dimension_numbers<[1], [0], [0], [1], [0, 0, 1, 1], [], []>} : vector<8x128xf32>, vector<128x128xf32>, vector<8x128xf32> -> vector<8x128xf32>
    %87 = arith.addf %86, %12 : vector<8x128xf32>
    %88 = arith.index_cast %c5_i32 : i32 to index
    %c0_48 = arith.constant 0 : index
    %c0_49 = arith.constant 0 : index
    %89 = vector.load %arg7[%88, %c0_48, %c0_49] : memref<8x8x128xf32, #tpu.memory_space<vmem>>, vector<1x8x128xf32>
    %90 = vector.shape_cast %89 : vector<1x8x128xf32> to vector<8x128xf32>
    %91 = vector.shape_cast %87 : vector<8x128xf32> to vector<1x8x128xf32>
    tpu.vector_store %arg7[%88, %c0_48, %c0_49], %91 {strides = array<i32>} : memref<8x8x128xf32, #tpu.memory_space<vmem>>, vector<1x8x128xf32>,
    %c6_i32 = arith.constant 6 : i32
    %c8_i32_50 = arith.constant 8 : i32
    %92 = arith.muli %c6_i32, %c8_i32_50 : i32
    %93 = tpu.assume_multiple %92, 8 : i32
    %94 = arith.index_cast %93 : i32 to index
    %c0_51 = arith.constant 0 : index
    %95 = vector.load %arg8[%94, %c0_51] : memref<64x128xf32, #tpu.memory_space<vmem>>, vector<8x128xf32>
    %cst_52 = arith.constant dense<0.000000e+00> : vector<8x128xf32>
    %96 = tpu.matmul %85, %8, %cst_52 {dimension_numbers = #tpu.dot_dimension_numbers<[1], [0], [0], [1], [0, 0, 1, 1], [], []>} : vector<8x128xf32>, vector<128x128xf32>, vector<8x128xf32> -> vector<8x128xf32>
    %97 = arith.addf %95, %96 : vector<8x128xf32>
    %98 = math.tanh %97 : vector<8x128xf32>
    %cst_53 = arith.constant dense<0.000000e+00> : vector<8x128xf32>
    %99 = tpu.matmul %98, %9, %cst_53 {dimension_numbers = #tpu.dot_dimension_numbers<[1], [0], [0], [1], [0, 0, 1, 1], [], []>} : vector<8x128xf32>, vector<128x128xf32>, vector<8x128xf32> -> vector<8x128xf32>
    %100 = arith.addf %99, %12 : vector<8x128xf32>
    %101 = arith.index_cast %c6_i32 : i32 to index
    %c0_54 = arith.constant 0 : index
    %c0_55 = arith.constant 0 : index
    %102 = vector.load %arg7[%101, %c0_54, %c0_55] : memref<8x8x128xf32, #tpu.memory_space<vmem>>, vector<1x8x128xf32>
    %103 = vector.shape_cast %102 : vector<1x8x128xf32> to vector<8x128xf32>
    %104 = vector.shape_cast %100 : vector<8x128xf32> to vector<1x8x128xf32>
    tpu.vector_store %arg7[%101, %c0_54, %c0_55], %104 {strides = array<i32>} : memref<8x8x128xf32, #tpu.memory_space<vmem>>, vector<1x8x128xf32>,
    %c7_i32 = arith.constant 7 : i32
    %c8_i32_56 = arith.constant 8 : i32
    %105 = arith.muli %c7_i32, %c8_i32_56 : i32
    %106 = tpu.assume_multiple %105, 8 : i32
    %107 = arith.index_cast %106 : i32 to index
    %c0_57 = arith.constant 0 : index
    %108 = vector.load %arg8[%107, %c0_57] : memref<64x128xf32, #tpu.memory_space<vmem>>, vector<8x128xf32>
    %cst_58 = arith.constant dense<0.000000e+00> : vector<8x128xf32>
    %109 = tpu.matmul %98, %8, %cst_58 {dimension_numbers = #tpu.dot_dimension_numbers<[1], [0], [0], [1], [0, 0, 1, 1], [], []>} : vector<8x128xf32>, vector<128x128xf32>, vector<8x128xf32> -> vector<8x128xf32>
    %110 = arith.addf %108, %109 : vector<8x128xf32>
    %111 = math.tanh %110 : vector<8x128xf32>
    %cst_59 = arith.constant dense<0.000000e+00> : vector<8x128xf32>
    %112 = tpu.matmul %111, %9, %cst_59 {dimension_numbers = #tpu.dot_dimension_numbers<[1], [0], [0], [1], [0, 0, 1, 1], [], []>} : vector<8x128xf32>, vector<128x128xf32>, vector<8x128xf32> -> vector<8x128xf32>
    %113 = arith.addf %112, %12 : vector<8x128xf32>
    %114 = arith.index_cast %c7_i32 : i32 to index
    %c0_60 = arith.constant 0 : index
    %c0_61 = arith.constant 0 : index
    %115 = vector.load %arg7[%114, %c0_60, %c0_61] : memref<8x8x128xf32, #tpu.memory_space<vmem>>, vector<1x8x128xf32>
    %116 = vector.shape_cast %115 : vector<1x8x128xf32> to vector<8x128xf32>
    %117 = vector.shape_cast %113 : vector<8x128xf32> to vector<1x8x128xf32>
    tpu.vector_store %arg7[%114, %c0_60, %c0_61], %117 {strides = array<i32>} : memref<8x8x128xf32, #tpu.memory_space<vmem>>, vector<1x8x128xf32>,
    %c8_i32_62 = arith.constant 8 : i32
    return
  }
  func.func @transform_0(%arg0: i32) -> (i32, i32, i32) {
    %c0_i32 = arith.constant 0 : i32
    %c0_i32_0 = arith.constant 0 : i32
    %c0_i32_1 = arith.constant 0 : i32
    return %c0_i32, %arg0, %c0_i32_0 : i32, i32, i32
  }
  func.func @transform_1(%arg0: i32) -> (i32, i32) {
    %c0_i32 = arith.constant 0 : i32
    %c0_i32_0 = arith.constant 0 : i32
    %c0_i32_1 = arith.constant 0 : i32
    return %c0_i32, %c0_i32_0 : i32, i32
  }
  func.func @transform_2(%arg0: i32) -> (i32, i32) {
    %c0_i32 = arith.constant 0 : i32
    %c0_i32_0 = arith.constant 0 : i32
    %c0_i32_1 = arith.constant 0 : i32
    return %c0_i32, %c0_i32_0 : i32, i32
  }
  func.func @transform_3(%arg0: i32) -> (i32, i32) {
    %c0_i32 = arith.constant 0 : i32
    %c0_i32_0 = arith.constant 0 : i32
    %c0_i32_1 = arith.constant 0 : i32
    return %c0_i32, %c0_i32_0 : i32, i32
  }
  func.func @transform_4(%arg0: i32) -> (i32, i32) {
    %c0_i32 = arith.constant 0 : i32
    %c0_i32_0 = arith.constant 0 : i32
    %c0_i32_1 = arith.constant 0 : i32
    return %c0_i32, %c0_i32_0 : i32, i32
  }
  func.func @transform_5(%arg0: i32) -> (i32, i32) {
    %c0_i32 = arith.constant 0 : i32
    %c0_i32_0 = arith.constant 0 : i32
    %c0_i32_1 = arith.constant 0 : i32
    return %c0_i32, %c0_i32_0 : i32, i32
  }
  func.func @transform_6(%arg0: i32) -> (i32, i32, i32) {
    %c0_i32 = arith.constant 0 : i32
    %c0_i32_0 = arith.constant 0 : i32
    %c0_i32_1 = arith.constant 0 : i32
    return %c0_i32, %arg0, %c0_i32_0 : i32, i32, i32
  }
}

</mosaic_0001>

<bundles_post_ra>
// kernel: tpu_custom_call.1
= control target key start
LH: loop header
LB: loop body
LE: loop exit
PB: predicated region body
PF: predicated region fallthrough
CT: control target
= control target key end

     0   :  { %11 = vsyncpa [#allocation4], 0  ;;  %s3405_s0 = inlined_call_operand.hbm [shape: f32[8,8,128], index: 0, kind: input, shape index: {}]   ;;  %s3406_s1 = inlined_call_operand.hbm [shape: f32[128,128], index: 1, kind: input, shape index: {}]   ;;  %s3407_s2 = inlined_call_operand.hbm [shape: f32[128,128], index: 2, kind: input, shape index: {}]   ;;  %s3408_s3 = inlined_call_operand.vmem [shape: f32[1,128], index: 3, kind: input, shape index: {}]   ;;  %s3409_s4 = inlined_call_operand.hbm [shape: f32[128,128], index: 4, kind: input, shape index: {}]   ;;  %s3410_s5 = inlined_call_operand.vmem [shape: f32[1,128], index: 5, kind: input, shape index: {}]   ;;  %s3411_s6 = inlined_call_operand.hbm [shape: f32[8,8,128], index: 6, kind: output, shape index: {}]  }
   0x1   :  { %12 = vsyncpa [#allocation7], 0 }
   0x2   :  { %13 = vsyncpa [#allocation10], 0 }
   0x3   :  { %14 = vsyncpa [#allocation5], 0  ;;  %s2909_s21 = smov [#allocation6]   ;;  %s2910_s23 = smov [#allocation3]  }
   0x4   :  { %s32_s22 = sshll.u32 %s2909_s21, 4  ;;  %s20_s24 = sshll.u32 %s2910_s23, 4  ;;  %s33_s22 = int_to_ptr.vmem [resolvable:$true] %s32_s22  ;;  %s2954_s24 = int_to_ptr.vmem [resolvable:$true] %s20_s24 }
   0x5   :  { %s2791_s27 = scalar_lea.hbm %s3406_s1, 2048 }
   0x6   :  { %p2792_p0 = scmp.ne.s32.totalorder %s3406_s1, %s2791_s27  ;;  %p2795_p1 = scmp.lt.u32.totalorder %s2791_s27, %s3406_s1 }
   0x8   :  { %p2797_p2 = pnand %p2795_p1, %p2792_p0 }
   0xa   :  { %2800 = shalt.err (!%p2797_p2)
}
   0xb   :  { %s2801_s8 = scalar_lea.vmem %s33_s22, 2048  ;;  %p2806_p4 = scmp.lt.s32.totalorder %s33_s22, %s33_s22 }
   0xc   :  { %p2802_p3 = scmp.ne.s32.totalorder %s33_s22, %s2801_s8  ;;  %p2807_p5 = scmp.lt.s32.totalorder %s2801_s8, %s2801_s8 }
   0xe   :  { %p2808_p6 = por %p2807_p5, %p2806_p4 }
  0x10   :  { %p2809_p7 = pnand %p2808_p6, %p2802_p3 }
  0x12   :  { %2812 = shalt.err (!%p2809_p7)
}
  0x13   :  { %s2911_s9 = smov 128   ;;  %s2912_s10 = smov 8  }
  0x14   :  { %38 = dma.hbm_to_vmem [thread:$0]  %s3406_s1, 2048, %s33_s22, [#allocation7], %s2911_s9, %s2911_s9, %s2912_s10  }
  0x15   :  { %s2813_s15 = scalar_lea.hbm %s3405_s0, 1024 }
  0x16   :  { %p2814_p8 = scmp.ne.s32.totalorder %s3405_s0, %s2813_s15  ;;  %p2817_p9 = scmp.lt.u32.totalorder %s2813_s15, %s3405_s0 }
  0x18   :  { %p2819_p10 = pnand %p2817_p9, %p2814_p8 }
  0x1a   :  { %2822 = shalt.err (!%p2819_p10)
}
  0x1b   :  { %s2823_s20 = scalar_lea.vmem %s2954_s24, 1024  ;;  %p2828_p12 = scmp.lt.s32.totalorder %s2954_s24, %s2954_s24 }
  0x1c   :  { %p2824_p11 = scmp.ne.s32.totalorder %s2954_s24, %s2823_s20  ;;  %p2829_p13 = scmp.lt.s32.totalorder %s2823_s20, %s2823_s20 }
  0x1e   :  { %p2830_p0 = por %p2829_p13, %p2828_p12 }
  0x20   :  { %p2831_p1 = pnand %p2830_p0, %p2824_p11 }
  0x22   :  { %2834 = shalt.err (!%p2831_p1)
}
  0x23   :  { %26 = dma.hbm_to_vmem [thread:$0]  %s3405_s0, 1024, %s2954_s24, [#allocation4], %s2911_s9, %s2911_s9, %s2912_s10  }
  0x24   :  { %s2913_s22 = smov [#allocation8]   ;;  %s2914_s25 = smov [#allocation9]  }
  0x25   :  { %s44_s23 = sshll.u32 %s2913_s22, 4  ;;  %s58_s26 = sshll.u32 %s2914_s25, 4  ;;  %s45_s23 = int_to_ptr.vmem [resolvable:$true] %s44_s23  ;;  %s2991_s26 = int_to_ptr.vmem [resolvable:$true] %s58_s26 }
  0x26   :  { %s2835_s29 = scalar_lea.hbm %s3407_s2, 2048 }
  0x27   :  { %p2836_p2 = scmp.ne.s32.totalorder %s3407_s2, %s2835_s29  ;;  %p2839_p3 = scmp.lt.u32.totalorder %s2835_s29, %s3407_s2 }
  0x29   :  { %p2841_p4 = pnand %p2839_p3, %p2836_p2 }
  0x2b   :  { %2844 = shalt.err (!%p2841_p4)
}
  0x2c   :  { %s2845_s0 = scalar_lea.vmem %s45_s23, 2048  ;;  %p2850_p6 = scmp.lt.s32.totalorder %s45_s23, %s45_s23 }
  0x2d   :  { %p2846_p5 = scmp.ne.s32.totalorder %s45_s23, %s2845_s0  ;;  %p2851_p7 = scmp.lt.s32.totalorder %s2845_s0, %s2845_s0 }
  0x2f   :  { %p2852_p8 = por %p2851_p7, %p2850_p6 }
  0x31   :  { %p2853_p9 = pnand %p2852_p8, %p2846_p5 }
  0x33   :  { %2856 = shalt.err (!%p2853_p9)
}
  0x34   :  { %50 = dma.hbm_to_vmem [thread:$0]  %s3407_s2, 2048, %s45_s23, [#allocation7], %s2911_s9, %s2911_s9, %s2912_s10  }
  0x35   :  { %s2857_s15 = scalar_lea.hbm %s3409_s4, 2048 }
  0x36   :  { %p2858_p10 = scmp.ne.s32.totalorder %s3409_s4, %s2857_s15  ;;  %p2861_p11 = scmp.lt.u32.totalorder %s2857_s15, %s3409_s4 }
  0x38   :  { %p2863_p12 = pnand %p2861_p11, %p2858_p10 }
  0x3a   :  { %2866 = shalt.err (!%p2863_p12)
}
  0x3b   :  { %s2867_s20 = scalar_lea.vmem %s2991_s26, 2048  ;;  %p2872_p0 = scmp.lt.s32.totalorder %s2991_s26, %s2991_s26 }
  0x3c   :  { %p2868_p13 = scmp.ne.s32.totalorder %s2991_s26, %s2867_s20  ;;  %p2873_p1 = scmp.lt.s32.totalorder %s2867_s20, %s2867_s20 }
  0x3e   :  { %p2874_p2 = por %p2873_p1, %p2872_p0 }
  0x40   :  { %p2875_p3 = pnand %p2874_p2, %p2868_p13 }
  0x42   :  { %2878 = shalt.err (!%p2875_p3)
}
  0x43   :  { %64 = dma.hbm_to_vmem [thread:$0]  %s3409_s4, 2048, %s2991_s26, [#allocation10], %s2911_s9, %s2911_s9, %s2912_s10  }
  0x44   :  { %2901 = dma.done.wait [#allocation4], 1024  }
  0x45   :  { %2902 = vsyncadd [#allocation4], 4294966272 }
  0x46   :  { %2903 = dma.done.wait [#allocation7], 4096  }
  0x47   :  { %2904 = vsyncadd [#allocation7], 4294963200 }
  0x48   :  { %2905 = dma.done.wait [#allocation10], 2048  }
  0x49   :  { %2906 = vsyncadd [#allocation10], 4294965248  ;;  %v2915_v0 = vmov 0.0|0.0   ;;  %vm2916_vm0 = vmmov 0   ;;  %v2917_v1 = vmov 0.0   ;;  %v87_v2 = vld [vmem:[#allocation6] sm:$0xff] }
  0x4a   :  { %2381 = vmatprep.subr.bf16.mxu1 %v2915_v0  ;;  %1821 = vmatprep.mubr.msk.f32.mxu1 %vm2916_vm0, %v2917_v1  ;;  %v88_v3 = vld [vmem:[#allocation6 + $0x8] sm:$0xff]  ;;  %v223_v4 = vld [vmem:[#allocation8] sm:$0xff]  ;;  %v89_v7 = vld [vmem:[#allocation6 + $0x10] sm:$0xff] }
  0x4b   :  { %v2349_v5 = vpack.c.bf16 %v88_v3, %v87_v2  ;;  %v224_v6 = vld [vmem:[#allocation8 + $0x8] sm:$0xff]  ;;  %v90_v8 = vld [vmem:[#allocation6 + $0x18] sm:$0xff]  ;;  %v225_v11 = vld [vmem:[#allocation8 + $0x10] sm:$0xff] }
  0x4c   :  { %v3031_v9 = vpack.c.bf16 %v224_v6, %v223_v4  ;;  %v2353_v10 = vpack.c.bf16 %v90_v8, %v89_v7  ;;  %v226_v12 = vld [vmem:[#allocation8 + $0x18] sm:$0xff]  ;;  %v91_v13 = vld [vmem:[#allocation6 + $0x20] sm:$0xff]  ;;  %v92_v14 = vld [vmem:[#allocation6 + $0x28] sm:$0xff] }
  0x4d   :  { %2350 = vmatprep.subr.bf16.mxu0 %v2349_v5  ;;  %v3034_v15 = vpack.c.bf16 %v226_v12, %v225_v11  ;;  %v2357_v16 = vpack.c.bf16 %v92_v14, %v91_v13  ;;  %v227_v17 = vld [vmem:[#allocation8 + $0x20] sm:$0xff]  ;;  %v228_v18 = vld [vmem:[#allocation8 + $0x28] sm:$0xff]  ;;  %v93_v19 = vld [vmem:[#allocation6 + $0x30] sm:$0xff] }
  0x4e   :  { %2352 = vmatpush3.bf16.msra.mxu0 %v2349_v5  ;;  %2383 = vmatpush3.bf16.msra.mxu1 %v3031_v9  ;;  %v94_v20 = vld [vmem:[#allocation6 + $0x38] sm:$0xff]  ;;  %v3038_v21 = vpack.c.bf16 %v228_v18, %v227_v17  ;;  %v229_v23 = vld [vmem:[#allocation8 + $0x30] sm:$0xff]  ;;  %v95_v25 = vld [vmem:[#allocation6 + $0x40] sm:$0xff] }
  0x4f   :  { %2354 = vmatprep.subr.bf16.mxu0 %v2353_v10  ;;  %2384 = vmatprep.subr.bf16.mxu1 %v2915_v0  ;;  %v2361_v22 = vpack.c.bf16 %v94_v20, %v93_v19  ;;  %v230_v24 = vld [vmem:[#allocation8 + $0x38] sm:$0xff]  ;;  %v96_v26 = vld [vmem:[#allocation6 + $0x48] sm:$0xff]  ;;  %v79_v27 = vld [vmem:[#allocation3] sm:$0xff] }
  0x50   :  { %1777 = vmatprep.mubr.f32.mxu0 %v79_v27  ;;  %v3042_v28 = vpack.c.bf16 %v230_v24, %v229_v23  ;;  %v2365_v29 = vpack.c.bf16 %v96_v26, %v95_v25  ;;  %v231_v30 = vld [vmem:[#allocation8 + $0x40] sm:$0xff]  ;;  %v232_v31 = vld [vmem:[#allocation8 + $0x48] sm:$0xff]  ;;  %v97_v32 = vld [vmem:[#allocation6 + $0x50] sm:$0xff] }
  0x51   :  { %v98_v33 = vld [vmem:[#allocation6 + $0x58] sm:$0xff]  ;;  %v3046_v34 = vpack.c.bf16 %v232_v31, %v231_v30  ;;  %v233_v36 = vld [vmem:[#allocation8 + $0x50] sm:$0xff]  ;;  %v99_v38 = vld [vmem:[#allocation6 + $0x60] sm:$0xff] }
  0x52   :  { %2356 = vmatpush3.bf16.msra.mxu0 %v2353_v10  ;;  %2386 = vmatpush3.bf16.msra.mxu1 %v3034_v15  ;;  %v2369_v35 = vpack.c.bf16 %v98_v33, %v97_v32  ;;  %v234_v37 = vld [vmem:[#allocation8 + $0x58] sm:$0xff]  ;;  %v100_v39 = vld [vmem:[#allocation6 + $0x68] sm:$0xff]  ;;  %v235_v42 = vld [vmem:[#allocation8 + $0x60] sm:$0xff] }
  0x53   :  { %2358 = vmatprep.subr.bf16.mxu0 %v2357_v16  ;;  %2387 = vmatprep.subr.bf16.mxu1 %v2915_v0  ;;  %v3050_v40 = vpack.c.bf16 %v234_v37, %v233_v36  ;;  %v2373_v41 = vpack.c.bf16 %v100_v39, %v99_v38  ;;  %v236_v43 = vld [vmem:[#allocation8 + $0x68] sm:$0xff]  ;;  %v101_v44 = vld [vmem:[#allocation6 + $0x70] sm:$0xff]  ;;  %v102_v45 = vld [vmem:[#allocation6 + $0x78] sm:$0xff] }
  0x54   :  { %v3054_v46 = vpack.c.bf16 %v236_v43, %v235_v42  ;;  %v2377_v47 = vpack.c.bf16 %v102_v45, %v101_v44  ;;  %v237_v48 = vld [vmem:[#allocation8 + $0x70] sm:$0xff]  ;;  %v238_v49 = vld [vmem:[#allocation8 + $0x78] sm:$0xff]  ;;  %v239_v51 = vld [vmem:[#allocation9] sm:$0xff] }
  0x55   :  { %v3058_v50 = vpack.c.bf16 %v238_v49, %v237_v48  ;;  %v240_v52 = vld [vmem:[#allocation9 + $0x8] sm:$0xff]  ;;  %v241_v55 = vld [vmem:[#allocation9 + $0x10] sm:$0xff]  ;;  %v242_v56 = vld [vmem:[#allocation9 + $0x18] sm:$0xff] }
  0x56   :  { %2360 = vmatpush3.bf16.msra.mxu0 %v2357_v16  ;;  %2389 = vmatpush3.bf16.msra.mxu1 %v3038_v21  ;;  %v80_v53 = vld [vmem:[#allocation3 + $0x8] sm:$0xff]  ;;  %v3062_v54 = vpack.c.bf16 %v240_v52, %v239_v51  ;;  %v3069_v57 = vpack.c.bf16 %v242_v56, %v241_v55  ;;  %v243_v58 = vld [vmem:[#allocation9 + $0x20] sm:$0xff]  ;;  %v245_v61 = vld [vmem:[#allocation9 + $0x30] sm:$0xff] }
  0x57   :  { %2362 = vmatprep.subr.bf16.mxu0 %v2361_v22  ;;  %2390 = vmatprep.subr.bf16.mxu1 %v2915_v0  ;;  %v244_v59 = vld [vmem:[#allocation9 + $0x28] sm:$0xff]  ;;  %v246_v62 = vld [vmem:[#allocation9 + $0x38] sm:$0xff]  ;;  %v247_v2 = vld [vmem:[#allocation9 + $0x40] sm:$0xff] }
  0x58   :  { %v3077_v60 = vpack.c.bf16 %v244_v59, %v243_v58  ;;  %v3083_v63 = vpack.c.bf16 %v246_v62, %v245_v61  ;;  %v248_v3 = vld [vmem:[#allocation9 + $0x48] sm:$0xff]  ;;  %v81_v5 = vld [vmem:[#allocation3 + $0x10] sm:$0xff]  ;;  %v250_v7 = vld [vmem:[#allocation9 + $0x58] sm:$0xff] }
  0x59   :  { %v3099_v4 = vpack.c.bf16 %v248_v3, %v247_v2  ;;  %v249_v6 = vld [vmem:[#allocation9 + $0x50] sm:$0xff]  ;;  %v82_v8 = vld [vmem:[#allocation3 + $0x18] sm:$0xff]  ;;  %v83_v11 = vld [vmem:[#allocation3 + $0x20] sm:$0xff] }
  0x5a   :  { %2364 = vmatpush3.bf16.msra.mxu0 %v2361_v22  ;;  %2392 = vmatpush3.bf16.msra.mxu1 %v3042_v28  ;;  %v3103_v10 = vpack.c.bf16 %v250_v7, %v249_v6  ;;  %v84_v12 = vld [vmem:[#allocation3 + $0x28] sm:$0xff]  ;;  %v251_v13 = vld [vmem:[#allocation9 + $0x60] sm:$0xff]  ;;  %v85_v16 = vld [vmem:[#allocation3 + $0x30] sm:$0xff] }
  0x5b   :  { %2366 = vmatprep.subr.bf16.mxu0 %v2365_v29  ;;  %2393 = vmatprep.subr.bf16.mxu1 %v2915_v0  ;;  %v252_v14 = vld [vmem:[#allocation9 + $0x68] sm:$0xff]  ;;  %v253_v18 = vld [vmem:[#allocation9 + $0x70] sm:$0xff]  ;;  %v254_v19 = vld [vmem:[#allocation9 + $0x78] sm:$0xff] }
  0x5c   :  { %v3107_v17 = vpack.c.bf16 %v252_v14, %v251_v13  ;;  %v86_v20 = vld [vmem:[#allocation3 + $0x38] sm:$0xff]  ;;  %v3110_v22 = vpack.c.bf16 %v254_v19, %v253_v18  ;;  %v3120_v23 = vld [vmem:[%s3408_s3] ss:$0 sm:$0xff] }
  0x5d   :  { %v3172_v39 = vld [vmem:[%s3410_s5] ss:$0 sm:$0xff]  ;;  %s2918_s5 = smov [#allocation11]  }
  0x5e   :  { %2368 = vmatpush3.bf16.msra.mxu0 %v2365_v29  ;;  %2395 = vmatpush3.bf16.msra.mxu1 %v3046_v34  ;;  %s1433_s23 = sshll.u32 %s2918_s5, 4  ;;  %s1434_s23 = int_to_ptr.vmem [resolvable:$true] %s1433_s23 }
  0x5f   :  { %2370 = vmatprep.subr.bf16.mxu0 %v2369_v35  ;;  %2396 = vmatprep.subr.bf16.mxu1 %v2915_v0  ;;  %s2879_s25 = scalar_lea.vmem %s1434_s23, 1024  ;;  %p2884_p5 = scmp.lt.s32.totalorder %s1434_s23, %s1434_s23 }
  0x60   :  { %p2880_p4 = scmp.ne.s32.totalorder %s1434_s23, %s2879_s25  ;;  %p2885_p6 = scmp.lt.s32.totalorder %s2879_s25, %s2879_s25 }
  0x62   :  { %2372 = vmatpush3.bf16.msra.mxu0 %v2369_v35  ;;  %2398 = vmatpush3.bf16.msra.mxu1 %v3050_v40  ;;  %p2886_p7 = por %p2885_p6, %p2884_p5 }
  0x63   :  { %2374 = vmatprep.subr.bf16.mxu0 %v2373_v41  ;;  %2399 = vmatprep.subr.bf16.mxu1 %v2915_v0 }
  0x64   :  { %p2887_p8 = pnand %p2886_p7, %p2880_p4 }
  0x66   :  { %2376 = vmatpush3.bf16.msra.mxu0 %v2373_v41  ;;  %2401 = vmatpush3.bf16.msra.mxu1 %v3054_v46 }
  0x67   :  { %2378 = vmatprep.subr.bf16.mxu0 %v2377_v47  ;;  %2402 = vmatprep.subr.bf16.mxu1 %v2915_v0 }
  0x6a   :  { %2380 = vmatpush3.bf16.msra.mxu0 %v2377_v47  ;;  %2404 = vmatpush3.bf16.msra.mxu1 %v3058_v50 }
  0x6b   :  { %2405 = vmatprep.subr.bf16.mxu0 %v2915_v0  ;;  %2429 = vmatprep.subr.bf16.mxu1 %v2915_v0 }
  0x6d   :  { %1778 = vmatmul.mubr.f32.vlgmr.msra.gmra.mrb[0].mxu0 %v80_v53  ;;  %1822 = vmatmul.mubr.f32.vlgmr.msra.gmra.mrb[0].mxu1 %v2917_v1 }
  0x6e   :  { %2407 = vmatpush3.bf16.msra.mxu0 %v3062_v54  ;;  %2431 = vmatpush3.bf16.msra.mxu1 %v3031_v9 }
  0x6f   :  { %2408 = vmatprep.subr.bf16.mxu0 %v2915_v0  ;;  %2432 = vmatprep.subr.bf16.mxu1 %v2915_v0 }
  0x70   :  { %1891 = vmatprep.mubr.msk.f32.mxu1 %vm2916_vm0, %v2917_v1  ;;  %1780 = vmatprep.mubr.f32.mxu0 %v81_v5 }
  0x71   :  { %1781 = vmatmul.mubr.f32.gmra.mrb[2].mxu0 %v82_v8 }
  0x72   :  { %2410 = vmatpush3.bf16.msra.mxu0 %v3069_v57  ;;  %2434 = vmatpush3.bf16.msra.mxu1 %v3034_v15 }
  0x73   :  { %2411 = vmatprep.subr.bf16.mxu0 %v2915_v0  ;;  %2435 = vmatprep.subr.bf16.mxu1 %v2915_v0 }
  0x74   :  { %1783 = vmatprep.mubr.f32.mxu0 %v83_v11 }
  0x75   :  { %1784 = vmatmul.mubr.f32.gmra.mrb[4].mxu0 %v84_v12 }
  0x76   :  { %2413 = vmatpush3.bf16.msra.mxu0 %v3077_v60  ;;  %2437 = vmatpush3.bf16.msra.mxu1 %v3038_v21 }
  0x77   :  { %2414 = vmatprep.subr.bf16.mxu0 %v2915_v0  ;;  %2438 = vmatprep.subr.bf16.mxu1 %v2915_v0 }
  0x78   :  { %1786 = vmatprep.mubr.f32.mxu0 %v85_v16 }
  0x79   :  { %1787 = vmatmul.mubr.f32.gmra.mrb[6].mxu0 %v86_v20 }
  0x7a   :  { %2416 = vmatpush3.bf16.msra.mxu0 %v3083_v63  ;;  %2440 = vmatpush3.bf16.msra.mxu1 %v3042_v28 }
  0x7b   :  { %2417 = vmatprep.subr.bf16.mxu0 %v2915_v0  ;;  %2441 = vmatprep.subr.bf16.mxu1 %v2915_v0 }
  0x7c   :  { %1856 = vmatprep.mubr.msk.f32.mxu0 %vm2916_vm0, %v2917_v1 }
  0x7e   :  { %2443 = vmatpush3.bf16.msra.mxu1 %v3046_v34  ;;  %2419 = vmatpush3.bf16.msra.mxu0 %v3099_v4 }
  0x7f   :  { %2444 = vmatprep.subr.bf16.mxu1 %v2915_v0  ;;  %2420 = vmatprep.subr.bf16.mxu0 %v2915_v0 }
  0x82   :  { %2446 = vmatpush3.bf16.msra.mxu1 %v3050_v40  ;;  %2422 = vmatpush3.bf16.msra.mxu0 %v3103_v10 }
  0x83   :  { %2447 = vmatprep.subr.bf16.mxu1 %v2915_v0  ;;  %2423 = vmatprep.subr.bf16.mxu0 %v2915_v0 }
  0x86   :  { %2449 = vmatpush3.bf16.msra.mxu1 %v3054_v46  ;;  %2425 = vmatpush3.bf16.msra.mxu0 %v3107_v17 }
  0x87   :  { %2450 = vmatprep.subr.bf16.mxu1 %v2915_v0  ;;  %2426 = vmatprep.subr.bf16.mxu0 %v2915_v0 }
  0x8a   :  { %2452 = vmatpush3.bf16.msra.mxu1 %v3058_v50  ;;  %2428 = vmatpush3.bf16.msra.mxu0 %v3110_v22 }
  0x8b   :  { %2477 = vmatprep.subr.bf16.mxu1 %v2915_v0  ;;  %2453 = vmatprep.subr.bf16.mxu0 %v2915_v0 }
 0x140   :  { %v1779_v24 = vpop.f32.mrb[0].mxu0  ;;  %v329_v25 = vpop.f32.mrb[0].mxu1 }
 0x141   :  { %v176_v26 = vpop.f32.mrb[1].mxu0  ;;  %v1823_v27 = vpop.f32.mrb[1].mxu1  ;;  %v182_v41 = vadd.f32 %v1779_v24, %v3120_v23 }
 0x142   :  { %v177_v29 = vadd.f32 %v3120_v23, %v176_v26 }
 0x144   :  { %v333_v30 = vadd.f32 %v329_v25, %v177_v29  ;;  %v3159_v32 = vpop.f32.mrb[2].mxu0 }
 0x145   :  { %v186_v33 = vpop.f32.mrb[3].mxu0  ;;  %v192_v62 = vadd.f32 %v3159_v32, %v3120_v23 }
 0x146   :  { %2775 = vtanh.f32 %v333_v30  ;;  %v187_v51 = vadd.f32 %v3120_v23, %v186_v33 }
 0x148   :  { %v3161_v35 = vpop.f32.mrb[4].mxu0 }
 0x149   :  { %v3163_v36 = vpop.f32.mrb[5].mxu0  ;;  %v202_v25 = vadd.f32 %v3161_v35, %v3120_v23 }
 0x14a   :  { %v197_v12 = vadd.f32 %v3120_v23, %v3163_v36 }
 0x14c   :  { %v3165_v37 = vpop.f32.mrb[6].mxu0 }
 0x14d   :  { %v3167_v38 = vpop.f32.mrb[7].mxu0 }
 0x150   :  { %v2776_v31 = vpop.eup %2775 }
 0x151   :  { %1857 = vmatmul.mubr.f32.vlgmr.msra.gmra.mrb[8].mxu0 %v2776_v31  ;;  %1892 = vmatmul.mubr.f32.vlgmr.msra.gmra.mrb[2].mxu1 %v2776_v31 }
 0x152   :  { %2455 = vmatpush3.bf16.msra.mxu0 %v3062_v54  ;;  %2479 = vmatpush3.bf16.msra.mxu1 %v3031_v9 }
 0x153   :  { %2456 = vmatprep.subr.bf16.mxu0 %v2915_v0  ;;  %2480 = vmatprep.subr.bf16.mxu1 %v2915_v0 }
 0x154   :  { %1926 = vmatprep.mubr.msk.f32.mxu0 %vm2916_vm0, %v2917_v1  ;;  %1961 = vmatprep.mubr.msk.f32.mxu1 %vm2916_vm0, %v2917_v1 }
 0x156   :  { %2458 = vmatpush3.bf16.msra.mxu0 %v3069_v57  ;;  %2482 = vmatpush3.bf16.msra.mxu1 %v3034_v15 }
 0x157   :  { %2459 = vmatprep.subr.bf16.mxu0 %v2915_v0  ;;  %2483 = vmatprep.subr.bf16.mxu1 %v2915_v0 }
 0x15a   :  { %2461 = vmatpush3.bf16.msra.mxu0 %v3077_v60  ;;  %2485 = vmatpush3.bf16.msra.mxu1 %v3038_v21 }
 0x15b   :  { %2462 = vmatprep.subr.bf16.mxu0 %v2915_v0  ;;  %2486 = vmatprep.subr.bf16.mxu1 %v2915_v0 }
 0x15e   :  { %2464 = vmatpush3.bf16.msra.mxu0 %v3083_v63  ;;  %2488 = vmatpush3.bf16.msra.mxu1 %v3042_v28 }
 0x15f   :  { %2465 = vmatprep.subr.bf16.mxu0 %v2915_v0  ;;  %2489 = vmatprep.subr.bf16.mxu1 %v2915_v0 }
 0x162   :  { %2467 = vmatpush3.bf16.msra.mxu0 %v3099_v4  ;;  %2491 = vmatpush3.bf16.msra.mxu1 %v3046_v34 }
 0x163   :  { %2468 = vmatprep.subr.bf16.mxu0 %v2915_v0  ;;  %2492 = vmatprep.subr.bf16.mxu1 %v2915_v0 }
 0x166   :  { %2470 = vmatpush3.bf16.msra.mxu0 %v3103_v10  ;;  %2494 = vmatpush3.bf16.msra.mxu1 %v3050_v40 }
 0x167   :  { %2471 = vmatprep.subr.bf16.mxu0 %v2915_v0  ;;  %2495 = vmatprep.subr.bf16.mxu1 %v2915_v0 }
 0x16a   :  { %2473 = vmatpush3.bf16.msra.mxu0 %v3107_v17  ;;  %2497 = vmatpush3.bf16.msra.mxu1 %v3054_v46 }
 0x16b   :  { %2474 = vmatprep.subr.bf16.mxu0 %v2915_v0  ;;  %2498 = vmatprep.subr.bf16.mxu1 %v2915_v0 }
 0x16e   :  { %2476 = vmatpush3.bf16.msra.mxu0 %v3110_v22  ;;  %2500 = vmatpush3.bf16.msra.mxu1 %v3058_v50 }
 0x16f   :  { %2501 = vmatprep.subr.bf16.mxu0 %v2915_v0  ;;  %2525 = vmatprep.subr.bf16.mxu1 %v2915_v0 }
 0x224   :  { %v401_v42 = vpop.f32.mrb[8].mxu0  ;;  %v474_v43 = vpop.f32.mrb[2].mxu1 }
 0x225   :  { %v402_v44 = vadd.f32 %v3172_v39, %v401_v42  ;;  %v478_v45 = vadd.f32 %v474_v43, %v182_v41  ;;  %v1858_v47 = vpop.f32.mrb[9].mxu0  ;;  %v1893_v48 = vpop.f32.mrb[3].mxu1 }
 0x227   :  { %405 = vst [vmem:[#allocation11] sm:$0xff] %v402_v44  ;;  %2777 = vtanh.f32 %v478_v45 }
 0x231   :  { %v2778_v49 = vpop.eup %2777 }
 0x232   :  { %1927 = vmatmul.mubr.f32.vlgmr.msra.gmra.mrb[10].mxu0 %v2778_v49  ;;  %1962 = vmatmul.mubr.f32.vlgmr.msra.gmra.mrb[4].mxu1 %v2778_v49 }
 0x233   :  { %2503 = vmatpush3.bf16.msra.mxu0 %v3062_v54  ;;  %2527 = vmatpush3.bf16.msra.mxu1 %v3031_v9 }
 0x234   :  { %2504 = vmatprep.subr.bf16.mxu0 %v2915_v0  ;;  %2528 = vmatprep.subr.bf16.mxu1 %v2915_v0 }
 0x235   :  { %1996 = vmatprep.mubr.msk.f32.mxu0 %vm2916_vm0, %v2917_v1  ;;  %2031 = vmatprep.mubr.msk.f32.mxu1 %vm2916_vm0, %v2917_v1 }
 0x237   :  { %2506 = vmatpush3.bf16.msra.mxu0 %v3069_v57  ;;  %2530 = vmatpush3.bf16.msra.mxu1 %v3034_v15 }
 0x238   :  { %2507 = vmatprep.subr.bf16.mxu0 %v2915_v0  ;;  %2531 = vmatprep.subr.bf16.mxu1 %v2915_v0 }
 0x23b   :  { %2509 = vmatpush3.bf16.msra.mxu0 %v3077_v60  ;;  %2533 = vmatpush3.bf16.msra.mxu1 %v3038_v21 }
 0x23c   :  { %2510 = vmatprep.subr.bf16.mxu0 %v2915_v0  ;;  %2534 = vmatprep.subr.bf16.mxu1 %v2915_v0 }
 0x23f   :  { %2512 = vmatpush3.bf16.msra.mxu0 %v3083_v63  ;;  %2536 = vmatpush3.bf16.msra.mxu1 %v3042_v28 }
 0x240   :  { %2513 = vmatprep.subr.bf16.mxu0 %v2915_v0  ;;  %2537 = vmatprep.subr.bf16.mxu1 %v2915_v0 }
 0x243   :  { %2515 = vmatpush3.bf16.msra.mxu0 %v3099_v4  ;;  %2539 = vmatpush3.bf16.msra.mxu1 %v3046_v34 }
 0x244   :  { %2516 = vmatprep.subr.bf16.mxu0 %v2915_v0  ;;  %2540 = vmatprep.subr.bf16.mxu1 %v2915_v0 }
 0x247   :  { %2518 = vmatpush3.bf16.msra.mxu0 %v3103_v10  ;;  %2542 = vmatpush3.bf16.msra.mxu1 %v3050_v40 }
 0x248   :  { %2519 = vmatprep.subr.bf16.mxu0 %v2915_v0  ;;  %2543 = vmatprep.subr.bf16.mxu1 %v2915_v0 }
 0x24b   :  { %2521 = vmatpush3.bf16.msra.mxu0 %v3107_v17  ;;  %2545 = vmatpush3.bf16.msra.mxu1 %v3054_v46 }
 0x24c   :  { %2522 = vmatprep.subr.bf16.mxu0 %v2915_v0  ;;  %2546 = vmatprep.subr.bf16.mxu1 %v2915_v0 }
 0x24f   :  { %2524 = vmatpush3.bf16.msra.mxu0 %v3110_v22  ;;  %2548 = vmatpush3.bf16.msra.mxu1 %v3058_v50 }
 0x250   :  { %2549 = vmatprep.subr.bf16.mxu0 %v2915_v0  ;;  %2573 = vmatprep.subr.bf16.mxu1 %v2915_v0 }
 0x305   :  { %v546_v52 = vpop.f32.mrb[10].mxu0  ;;  %v620_v53 = vpop.f32.mrb[4].mxu1 }
 0x306   :  { %v547_v55 = vadd.f32 %v3172_v39, %v546_v52  ;;  %v624_v56 = vadd.f32 %v620_v53, %v187_v51  ;;  %v1928_v58 = vpop.f32.mrb[11].mxu0  ;;  %v1963_v59 = vpop.f32.mrb[5].mxu1 }
 0x308   :  { %551 = vst [vmem:[#allocation11 + $0x8] sm:$0xff] %v547_v55  ;;  %2779 = vtanh.f32 %v624_v56 }
 0x312   :  { %v2780_v61 = vpop.eup %2779 }
 0x313   :  { %1997 = vmatmul.mubr.f32.vlgmr.msra.gmra.mrb[12].mxu0 %v2780_v61  ;;  %2032 = vmatmul.mubr.f32.vlgmr.msra.gmra.mrb[6].mxu1 %v2780_v61 }
 0x314   :  { %2551 = vmatpush3.bf16.msra.mxu0 %v3062_v54  ;;  %2575 = vmatpush3.bf16.msra.mxu1 %v3031_v9 }
 0x315   :  { %2552 = vmatprep.subr.bf16.mxu0 %v2915_v0  ;;  %2576 = vmatprep.subr.bf16.mxu1 %v2915_v0 }
 0x316   :  { %2066 = vmatprep.mubr.msk.f32.mxu0 %vm2916_vm0, %v2917_v1  ;;  %2101 = vmatprep.mubr.msk.f32.mxu1 %vm2916_vm0, %v2917_v1 }
 0x318   :  { %2554 = vmatpush3.bf16.msra.mxu0 %v3069_v57  ;;  %2578 = vmatpush3.bf16.msra.mxu1 %v3034_v15 }
 0x319   :  { %2555 = vmatprep.subr.bf16.mxu0 %v2915_v0  ;;  %2579 = vmatprep.subr.bf16.mxu1 %v2915_v0 }
 0x31c   :  { %2557 = vmatpush3.bf16.msra.mxu0 %v3077_v60  ;;  %2581 = vmatpush3.bf16.msra.mxu1 %v3038_v21 }
 0x31d   :  { %2558 = vmatprep.subr.bf16.mxu0 %v2915_v0  ;;  %2582 = vmatprep.subr.bf16.mxu1 %v2915_v0 }
 0x320   :  { %2560 = vmatpush3.bf16.msra.mxu0 %v3083_v63  ;;  %2584 = vmatpush3.bf16.msra.mxu1 %v3042_v28 }
 0x321   :  { %2561 = vmatprep.subr.bf16.mxu0 %v2915_v0  ;;  %2585 = vmatprep.subr.bf16.mxu1 %v2915_v0 }
 0x324   :  { %2563 = vmatpush3.bf16.msra.mxu0 %v3099_v4  ;;  %2587 = vmatpush3.bf16.msra.mxu1 %v3046_v34 }
 0x325   :  { %2564 = vmatprep.subr.bf16.mxu0 %v2915_v0  ;;  %2588 = vmatprep.subr.bf16.mxu1 %v2915_v0 }
 0x328   :  { %2566 = vmatpush3.bf16.msra.mxu0 %v3103_v10  ;;  %2590 = vmatpush3.bf16.msra.mxu1 %v3050_v40 }
 0x329   :  { %2567 = vmatprep.subr.bf16.mxu0 %v2915_v0  ;;  %2591 = vmatprep.subr.bf16.mxu1 %v2915_v0 }
 0x32c   :  { %2569 = vmatpush3.bf16.msra.mxu0 %v3107_v17  ;;  %2593 = vmatpush3.bf16.msra.mxu1 %v3054_v46 }
 0x32d   :  { %2570 = vmatprep.subr.bf16.mxu0 %v2915_v0  ;;  %2594 = vmatprep.subr.bf16.mxu1 %v2915_v0 }
 0x330   :  { %2572 = vmatpush3.bf16.msra.mxu0 %v3110_v22  ;;  %2596 = vmatpush3.bf16.msra.mxu1 %v3058_v50 }
 0x331   :  { %2597 = vmatprep.subr.bf16.mxu0 %v2915_v0  ;;  %2621 = vmatprep.subr.bf16.mxu1 %v2915_v0 }
 0x3e6   :  { %v692_v2 = vpop.f32.mrb[12].mxu0  ;;  %v766_v3 = vpop.f32.mrb[6].mxu1 }
 0x3e7   :  { %v693_v5 = vadd.f32 %v3172_v39, %v692_v2  ;;  %v770_v6 = vadd.f32 %v766_v3, %v192_v62  ;;  %v1998_v7 = vpop.f32.mrb[13].mxu0  ;;  %v2033_v8 = vpop.f32.mrb[7].mxu1 }
 0x3e9   :  { %697 = vst [vmem:[#allocation11 + $0x10] sm:$0xff] %v693_v5  ;;  %2781 = vtanh.f32 %v770_v6 }
 0x3f3   :  { %v2782_v11 = vpop.eup %2781 }
 0x3f4   :  { %2067 = vmatmul.mubr.f32.vlgmr.msra.gmra.mrb[14].mxu0 %v2782_v11  ;;  %2102 = vmatmul.mubr.f32.vlgmr.msra.gmra.mrb[8].mxu1 %v2782_v11 }
 0x3f5   :  { %2599 = vmatpush3.bf16.msra.mxu0 %v3062_v54  ;;  %2623 = vmatpush3.bf16.msra.mxu1 %v3031_v9 }
 0x3f6   :  { %2600 = vmatprep.subr.bf16.mxu0 %v2915_v0  ;;  %2624 = vmatprep.subr.bf16.mxu1 %v2915_v0 }
 0x3f7   :  { %2136 = vmatprep.mubr.msk.f32.mxu0 %vm2916_vm0, %v2917_v1  ;;  %2171 = vmatprep.mubr.msk.f32.mxu1 %vm2916_vm0, %v2917_v1 }
 0x3f9   :  { %2602 = vmatpush3.bf16.msra.mxu0 %v3069_v57  ;;  %2626 = vmatpush3.bf16.msra.mxu1 %v3034_v15 }
 0x3fa   :  { %2603 = vmatprep.subr.bf16.mxu0 %v2915_v0  ;;  %2627 = vmatprep.subr.bf16.mxu1 %v2915_v0 }
 0x3fd   :  { %2605 = vmatpush3.bf16.msra.mxu0 %v3077_v60  ;;  %2629 = vmatpush3.bf16.msra.mxu1 %v3038_v21 }
 0x3fe   :  { %2606 = vmatprep.subr.bf16.mxu0 %v2915_v0  ;;  %2630 = vmatprep.subr.bf16.mxu1 %v2915_v0 }
 0x401   :  { %2608 = vmatpush3.bf16.msra.mxu0 %v3083_v63  ;;  %2632 = vmatpush3.bf16.msra.mxu1 %v3042_v28 }
 0x402   :  { %2609 = vmatprep.subr.bf16.mxu0 %v2915_v0  ;;  %2633 = vmatprep.subr.bf16.mxu1 %v2915_v0 }
 0x405   :  { %2611 = vmatpush3.bf16.msra.mxu0 %v3099_v4  ;;  %2635 = vmatpush3.bf16.msra.mxu1 %v3046_v34 }
 0x406   :  { %2612 = vmatprep.subr.bf16.mxu0 %v2915_v0  ;;  %2636 = vmatprep.subr.bf16.mxu1 %v2915_v0 }
 0x409   :  { %2614 = vmatpush3.bf16.msra.mxu0 %v3103_v10  ;;  %2638 = vmatpush3.bf16.msra.mxu1 %v3050_v40 }
 0x40a   :  { %2615 = vmatprep.subr.bf16.mxu0 %v2915_v0  ;;  %2639 = vmatprep.subr.bf16.mxu1 %v2915_v0 }
 0x40d   :  { %2617 = vmatpush3.bf16.msra.mxu0 %v3107_v17  ;;  %2641 = vmatpush3.bf16.msra.mxu1 %v3054_v46 }
 0x40e   :  { %2618 = vmatprep.subr.bf16.mxu0 %v2915_v0  ;;  %2642 = vmatprep.subr.bf16.mxu1 %v2915_v0 }
 0x411   :  { %2620 = vmatpush3.bf16.msra.mxu0 %v3110_v22  ;;  %2644 = vmatpush3.bf16.msra.mxu1 %v3058_v50 }
 0x412   :  { %2645 = vmatprep.subr.bf16.mxu0 %v2915_v0  ;;  %2669 = vmatprep.subr.bf16.mxu1 %v2915_v0 }
 0x4c7   :  { %v838_v13 = vpop.f32.mrb[14].mxu0  ;;  %v912_v14 = vpop.f32.mrb[8].mxu1 }
 0x4c8   :  { %v839_v16 = vadd.f32 %v3172_v39, %v838_v13  ;;  %v916_v18 = vadd.f32 %v912_v14, %v197_v12  ;;  %v2068_v19 = vpop.f32.mrb[15].mxu0  ;;  %v2103_v20 = vpop.f32.mrb[9].mxu1 }
 0x4ca   :  { %843 = vst [vmem:[#allocation11 + $0x18] sm:$0xff] %v839_v16  ;;  %2783 = vtanh.f32 %v916_v18 }
 0x4d4   :  { %v2784_v24 = vpop.eup %2783 }
 0x4d5   :  { %2137 = vmatmul.mubr.f32.vlgmr.msra.gmra.mrb[16].mxu0 %v2784_v24  ;;  %2172 = vmatmul.mubr.f32.vlgmr.msra.gmra.mrb[10].mxu1 %v2784_v24 }
 0x4d6   :  { %2647 = vmatpush3.bf16.msra.mxu0 %v3062_v54  ;;  %2671 = vmatpush3.bf16.msra.mxu1 %v3031_v9 }
 0x4d7   :  { %2648 = vmatprep.subr.bf16.mxu0 %v2915_v0  ;;  %2672 = vmatprep.subr.bf16.mxu1 %v2915_v0 }
 0x4d8   :  { %2206 = vmatprep.mubr.msk.f32.mxu0 %vm2916_vm0, %v2917_v1  ;;  %2241 = vmatprep.mubr.msk.f32.mxu1 %vm2916_vm0, %v2917_v1 }
 0x4da   :  { %2650 = vmatpush3.bf16.msra.mxu0 %v3069_v57  ;;  %2674 = vmatpush3.bf16.msra.mxu1 %v3034_v15 }
 0x4db   :  { %2651 = vmatprep.subr.bf16.mxu0 %v2915_v0  ;;  %2675 = vmatprep.subr.bf16.mxu1 %v2915_v0 }
 0x4de   :  { %2653 = vmatpush3.bf16.msra.mxu0 %v3077_v60  ;;  %2677 = vmatpush3.bf16.msra.mxu1 %v3038_v21 }
 0x4df   :  { %2654 = vmatprep.subr.bf16.mxu0 %v2915_v0  ;;  %2678 = vmatprep.subr.bf16.mxu1 %v2915_v0 }
 0x4e2   :  { %2656 = vmatpush3.bf16.msra.mxu0 %v3083_v63  ;;  %2680 = vmatpush3.bf16.msra.mxu1 %v3042_v28 }
 0x4e3   :  { %2657 = vmatprep.subr.bf16.mxu0 %v2915_v0  ;;  %2681 = vmatprep.subr.bf16.mxu1 %v2915_v0 }
 0x4e6   :  { %2659 = vmatpush3.bf16.msra.mxu0 %v3099_v4  ;;  %2683 = vmatpush3.bf16.msra.mxu1 %v3046_v34 }
 0x4e7   :  { %2660 = vmatprep.subr.bf16.mxu0 %v2915_v0  ;;  %2684 = vmatprep.subr.bf16.mxu1 %v2915_v0 }
 0x4ea   :  { %2662 = vmatpush3.bf16.msra.mxu0 %v3103_v10  ;;  %2686 = vmatpush3.bf16.msra.mxu1 %v3050_v40 }
 0x4eb   :  { %2663 = vmatprep.subr.bf16.mxu0 %v2915_v0  ;;  %2687 = vmatprep.subr.bf16.mxu1 %v2915_v0 }
 0x4ee   :  { %2665 = vmatpush3.bf16.msra.mxu0 %v3107_v17  ;;  %2689 = vmatpush3.bf16.msra.mxu1 %v3054_v46 }
 0x4ef   :  { %2666 = vmatprep.subr.bf16.mxu0 %v2915_v0  ;;  %2690 = vmatprep.subr.bf16.mxu1 %v2915_v0 }
 0x4f2   :  { %2668 = vmatpush3.bf16.msra.mxu0 %v3110_v22  ;;  %2692 = vmatpush3.bf16.msra.mxu1 %v3058_v50 }
 0x4f3   :  { %2693 = vmatprep.subr.bf16.mxu0 %v2915_v0  ;;  %2717 = vmatprep.subr.bf16.mxu1 %v2915_v0 }
 0x5a8   :  { %v984_v26 = vpop.f32.mrb[16].mxu0  ;;  %v1058_v27 = vpop.f32.mrb[10].mxu1 }
 0x5a9   :  { %v985_v29 = vadd.f32 %v3172_v39, %v984_v26  ;;  %v1062_v30 = vadd.f32 %v1058_v27, %v202_v25  ;;  %v2138_v31 = vpop.f32.mrb[17].mxu0  ;;  %v2173_v32 = vpop.f32.mrb[11].mxu1 }
 0x5ab   :  { %989 = vst [vmem:[#allocation11 + $0x20] sm:$0xff] %v985_v29  ;;  %2785 = vtanh.f32 %v1062_v30 }
 0x5b5   :  { %v2786_v33 = vpop.eup %2785 }
 0x5b6   :  { %2207 = vmatmul.mubr.f32.vlgmr.msra.gmra.mrb[18].mxu0 %v2786_v33  ;;  %2242 = vmatmul.mubr.f32.vlgmr.msra.gmra.mrb[12].mxu1 %v2786_v33 }
 0x5b7   :  { %2695 = vmatpush3.bf16.msra.mxu0 %v3062_v54  ;;  %2719 = vmatpush3.bf16.msra.mxu1 %v3031_v9  ;;  %v207_v9 = vadd.f32 %v3120_v23, %v3167_v38 }
 0x5b8   :  { %2696 = vmatprep.subr.bf16.mxu0 %v2915_v0  ;;  %2720 = vmatprep.subr.bf16.mxu1 %v2915_v0 }
 0x5b9   :  { %2276 = vmatprep.mubr.msk.f32.mxu0 %vm2916_vm0, %v2917_v1  ;;  %2311 = vmatprep.mubr.msk.f32.mxu1 %vm2916_vm0, %v2917_v1 }
 0x5bb   :  { %2698 = vmatpush3.bf16.msra.mxu0 %v3069_v57  ;;  %2722 = vmatpush3.bf16.msra.mxu1 %v3034_v15 }
 0x5bc   :  { %2699 = vmatprep.subr.bf16.mxu0 %v2915_v0  ;;  %2723 = vmatprep.subr.bf16.mxu1 %v2915_v0 }
 0x5bf   :  { %2701 = vmatpush3.bf16.msra.mxu0 %v3077_v60  ;;  %2725 = vmatpush3.bf16.msra.mxu1 %v3038_v21 }
 0x5c0   :  { %2702 = vmatprep.subr.bf16.mxu0 %v2915_v0  ;;  %2726 = vmatprep.subr.bf16.mxu1 %v2915_v0 }
 0x5c3   :  { %2704 = vmatpush3.bf16.msra.mxu0 %v3083_v63  ;;  %2728 = vmatpush3.bf16.msra.mxu1 %v3042_v28 }
 0x5c4   :  { %2705 = vmatprep.subr.bf16.mxu0 %v2915_v0  ;;  %2729 = vmatprep.subr.bf16.mxu1 %v2915_v0 }
 0x5c7   :  { %2707 = vmatpush3.bf16.msra.mxu0 %v3099_v4  ;;  %2731 = vmatpush3.bf16.msra.mxu1 %v3046_v34 }
 0x5c8   :  { %2708 = vmatprep.subr.bf16.mxu0 %v2915_v0  ;;  %2732 = vmatprep.subr.bf16.mxu1 %v2915_v0 }
 0x5cb   :  { %2710 = vmatpush3.bf16.msra.mxu0 %v3103_v10  ;;  %2734 = vmatpush3.bf16.msra.mxu1 %v3050_v40 }
 0x5cc   :  { %2711 = vmatprep.subr.bf16.mxu0 %v2915_v0  ;;  %2735 = vmatprep.subr.bf16.mxu1 %v2915_v0 }
 0x5cf   :  { %2713 = vmatpush3.bf16.msra.mxu0 %v3107_v17  ;;  %2737 = vmatpush3.bf16.msra.mxu1 %v3054_v46 }
 0x5d0   :  { %2714 = vmatprep.subr.bf16.mxu0 %v2915_v0  ;;  %2738 = vmatprep.subr.bf16.mxu1 %v2915_v0 }
 0x5d3   :  { %2716 = vmatpush3.bf16.msra.mxu0 %v3110_v22  ;;  %2740 = vmatpush3.bf16.msra.mxu1 %v3058_v50 }
 0x5d4   :  { %2741 = vmatprep.subr.bf16.mxu0 %v2915_v0 }
 0x689   :  { %v1130_v15 = vpop.f32.mrb[18].mxu0  ;;  %v1204_v21 = vpop.f32.mrb[12].mxu1 }
 0x68a   :  { %v1131_v28 = vadd.f32 %v3172_v39, %v1130_v15  ;;  %v1208_v34 = vadd.f32 %v1204_v21, %v207_v9  ;;  %v2208_v40 = vpop.f32.mrb[19].mxu0  ;;  %v2243_v46 = vpop.f32.mrb[13].mxu1 }
 0x68c   :  { %1135 = vst [vmem:[#allocation11 + $0x28] sm:$0xff] %v1131_v28  ;;  %2787 = vtanh.f32 %v1208_v34 }
 0x696   :  { %v2788_v35 = vpop.eup %2787 }
 0x697   :  { %2277 = vmatmul.mubr.f32.vlgmr.msra.gmra.mrb[20].mxu0 %v2788_v35  ;;  %2312 = vmatmul.mubr.f32.vlgmr.msra.gmra.mrb[14].mxu1 %v2788_v35 }
 0x698   :  { %2743 = vmatpush3.bf16.msra.mxu0 %v3062_v54  ;;  %2346 = vmatprep.mubr.msk.f32.mxu0 %vm2916_vm0, %v2917_v1  ;;  %v212_v1 = vadd.f32 %v3165_v37, %v3120_v23 }
 0x699   :  { %2744 = vmatprep.subr.bf16.mxu0 %v2915_v0 }
 0x69c   :  { %2746 = vmatpush3.bf16.msra.mxu0 %v3069_v57 }
 0x69d   :  { %2747 = vmatprep.subr.bf16.mxu0 %v2915_v0 }
 0x6a0   :  { %2749 = vmatpush3.bf16.msra.mxu0 %v3077_v60 }
 0x6a1   :  { %2750 = vmatprep.subr.bf16.mxu0 %v2915_v0 }
 0x6a4   :  { %2752 = vmatpush3.bf16.msra.mxu0 %v3083_v63 }
 0x6a5   :  { %2753 = vmatprep.subr.bf16.mxu0 %v2915_v0 }
 0x6a8   :  { %2755 = vmatpush3.bf16.msra.mxu0 %v3099_v4 }
 0x6a9   :  { %2756 = vmatprep.subr.bf16.mxu0 %v2915_v0 }
 0x6ac   :  { %2758 = vmatpush3.bf16.msra.mxu0 %v3103_v10 }
 0x6ad   :  { %2759 = vmatprep.subr.bf16.mxu0 %v2915_v0 }
 0x6b0   :  { %2761 = vmatpush3.bf16.msra.mxu0 %v3107_v17 }
 0x6b1   :  { %2762 = vmatprep.subr.bf16.mxu0 %v2915_v0 }
 0x6b4   :  { %2764 = vmatpush3.bf16.msra.mxu0 %v3110_v22 }
 0x76a   :  { %v1276_v50 = vpop.f32.mrb[20].mxu0  ;;  %v1350_v54 = vpop.f32.mrb[14].mxu1 }
 0x76b   :  { %v1277_v57 = vadd.f32 %v3172_v39, %v1276_v50  ;;  %v1354_v60 = vadd.f32 %v1350_v54, %v212_v1  ;;  %v2278_v63 = vpop.f32.mrb[21].mxu0  ;;  %v2313_v4 = vpop.f32.mrb[15].mxu1 }
 0x76d   :  { %1281 = vst [vmem:[#allocation11 + $0x30] sm:$0xff] %v1277_v57  ;;  %2789 = vtanh.f32 %v1354_v60 }
 0x777   :  { %v2790_v10 = vpop.eup %2789 }
 0x778   :  { %2347 = vmatmul.mubr.f32.vlgmr.msra.gmra.mrb[22].mxu0 %v2790_v10 }
 0x84b   :  { %v1422_v17 = vpop.f32.mrb[22].mxu0 }
 0x84c   :  { %v1423_v0 = vadd.f32 %v3172_v39, %v1422_v17  ;;  %v2348_v22 = vpop.f32.mrb[23].mxu0 }
 0x84e   :  { %1427 = vst [vmem:[#allocation11 + $0x38] sm:$0xff] %v1423_v0 }
 0x84f   :  { %2890 = shalt.err (!%p2887_p8)
}
 0x850   :  { %s2891_s28 = scalar_lea.hbm %s3411_s6, 1024 }
 0x851   :  { %p2892_p9 = scmp.ne.s32.totalorder %s3411_s6, %s2891_s28  ;;  %p2895_p10 = scmp.lt.u32.totalorder %s2891_s28, %s3411_s6 }
 0x853   :  { %p2897_p11 = pnand %p2895_p10, %p2892_p9 }
 0x855   :  { %2900 = shalt.err (!%p2897_p11)
}
 0x856   :  { %1439 = dma.vmem_to_hbm [thread:$0]  %s1434_s23, 1024, %s3411_s6, [#allocation5], %s2911_s9, %s2911_s9, %s2912_s10  }
 0x857   :  { %2907 = dma.done.wait [#allocation5], 1024  }
 0x858   :  { %2908 = vsyncadd [#allocation5], 4294966272 }
 0x859   :  { %1443 = vsyncpa [#allocation4], 1 }
 0x85a   :  { %1444 = vsyncpa [#allocation7], 1 }
 0x85b   :  { %1445 = vsyncpa [#allocation10], 1 }
 0x85c   :  { %1446 = vsyncpa [#allocation5], 1 }

</bundles_post_ra>
